<compile_context>
chip_gen: v7x
topology: tpu7x:2x2x1
jax: 0.10.0
libtpu: 0.0.40
codegen_flags: <defaults>
</compile_context>

<pallas_src>
import functools

import jax
import jax.numpy as jnp
from jax import lax
from jax.experimental import pallas as pl
from jax.experimental.pallas import tpu as pltpu


# ---------------------------------------------------------------------------
# Fused kernel: conv1d(k=3, pad=1, as one matmul) + GroupNorm + folded
# affine/FiLM + SiLU.  One grid step = (one batch element, one Cout tile).
# ---------------------------------------------------------------------------
def _block_kernel(x_ref, w_ref, p_ref, g_ref, gt_ref, o_ref, *, eps_gn, inv_n):
    # Conv: single MXU matmul, native-dtype operands, f32 accumulation.
    acc = jnp.dot(w_ref[...], x_ref[...],
                  preferred_element_type=jnp.float32)            # (tc, L) f32

    params = p_ref[...]                                          # (tc, 3) f32
    acc = acc + params[:, 0:1]                                   # conv bias

    # GroupNorm (two-pass, biased variance).  Reduce over L on the XLU first,
    # then channels -> groups -> channels via tiny precomputed one-hot matmuls.
    onehot = g_ref[...]                                          # (G,  tc) f32
    onehot_t = gt_ref[...]                                       # (tc, G ) f32

    sum_c = jnp.sum(acc, axis=1, keepdims=True)                  # (tc, 1)
    mean_c = jnp.dot(onehot_t,
                     jnp.dot(onehot, sum_c, preferred_element_type=jnp.float32),
                     preferred_element_type=jnp.float32) * inv_n
    centered = acc - mean_c
    sq_c = jnp.sum(centered * centered, axis=1, keepdims=True)   # (tc, 1)
    var_c = jnp.dot(onehot_t,
                    jnp.dot(onehot, sq_c, preferred_element_type=jnp.float32),
                    preferred_element_type=jnp.float32) * inv_n

    # Affine with FiLM folded in (gamma' = gamma*(scale+1), beta' = beta*(scale+1)+shift).
    y = centered * lax.rsqrt(var_c + eps_gn) * params[:, 1:2] + params[:, 2:3]
    y = y * jax.nn.sigmoid(y)                                    # SiLU
    o_ref[...] = y.astype(o_ref.dtype)


def _choose_cout_tile(cout, cg):
    """Largest clean Cout tile: whole groups, 128-lane aligned (one-hot block lane
    dim), divides Cout.  Falls back to full extent for small Cout."""
    for t in (256, 128):
        if cout > t and cout % t == 0 and t % cg == 0:
            return t
    return cout


# ---------------------------------------------------------------------------
# Wrapper
# ---------------------------------------------------------------------------
def block_pallas(x, weight, bias, gn_gamma, gn_beta, scale_shift=None, groups=8):
    """x: (B, Cin, L); weight: (Cout, Cin, K); bias/gn_gamma/gn_beta: (Cout,)."""
    B, Cin, L = x.shape
    Cout, _, K = weight.shape
    assert Cout % groups == 0, "GroupNorm requires Cout % groups == 0"
    pad = (K - 1) // 2
    cg = Cout // groups
    eps_ws = 1e-5 if x.dtype == jnp.float32 else 1e-3      # matches PyTorch reference

    # --- weight standardization: tiny, plain JAX (fused by XLA, no extra launch) ---
    w32 = weight.astype(jnp.float32)
    w_mean = jnp.mean(w32, axis=(1, 2), keepdims=True)
    w_var = jnp.mean((w32 - w_mean) ** 2, axis=(1, 2), keepdims=True)   # biased
    w_std = (w32 - w_mean) * lax.rsqrt(w_var + eps_ws)
    # (Cout, K*Cin) laid out tap-major / channel-minor to match the im2col rows.
    w2 = jnp.transpose(w_std, (0, 2, 1)).reshape(Cout, K * Cin).astype(x.dtype)

    # --- im2col (wrapper-side layout plumbing): 3-tap conv -> one matmul ---
    xpad = jnp.pad(x, ((0, 0), (0, 0), (pad, pad)))
    xcol = jnp.concatenate([xpad[:, :, k:k + L] for k in range(K)], axis=1)  # (B, K*Cin, L)

    # --- pack per-channel params; fold FiLM into the GroupNorm affine on the host ---
    if scale_shift is None:
        params = jnp.stack([bias, gn_gamma, gn_beta], axis=-1)[None]         # (1, Cout, 3)
    else:
        s, sh = scale_shift
        s1 = jnp.broadcast_to(s, (B, Cout, 1)).reshape(B, Cout).astype(jnp.float32) + 1.0
        sh2 = jnp.broadcast_to(sh, (B, Cout, 1)).reshape(B, Cout).astype(jnp.float32)
        gamma_eff = gn_gamma[None, :].astype(jnp.float32) * s1
        beta_eff = gn_beta[None, :].astype(jnp.float32) * s1 + sh2
        bias_b = jnp.broadcast_to(bias[None, :], (B, Cout)).astype(jnp.float32)
        params = jnp.stack([bias_b, gamma_eff, beta_eff], axis=-1)           # (B, Cout, 3)
    params = params.astype(jnp.float32)
    Bp = params.shape[0]

    # --- group-membership one-hot, precomputed once (constant across grid steps) ---
    ch_group = jnp.arange(Cout, dtype=jnp.int32) // cg
    onehot = (jnp.arange(groups, dtype=jnp.int32)[:, None] == ch_group[None, :]
              ).astype(jnp.float32)                                          # (G, Cout)
    onehot_t = onehot.T                                                      # (Cout, G)

    tcout = _choose_cout_tile(Cout, cg)
    n_ct = Cout // tcout
    # TODO(synk): very long L needs an L-tiled two-pass GroupNorm (cross-tile stats);
    # here L is kept as a single lane-dense block.

    kernel = functools.partial(_block_kernel, eps_gn=1e-5,
                               inv_n=float(1.0 / (cg * L)))
    p_map = (lambda b, co: (0, co, 0)) if Bp == 1 else (lambda b, co: (b, co, 0))

    return pl.pallas_call(
        kernel,
        out_shape=jax.ShapeDtypeStruct((B, Cout, L), x.dtype),
        grid_spec=pltpu.PrefetchScalarGridSpec(
            num_scalar_prefetch=0,
            grid=(B, n_ct),   # batch x Cout-tile, both parallel (megacore / 2-TC)
            in_specs=[
                pl.BlockSpec((None, K * Cin, L), lambda b, co: (b, 0, 0)),   # im2col x
                pl.BlockSpec((tcout, K * Cin), lambda b, co: (co, 0)),       # std weight
                pl.BlockSpec((None, tcout, 3), p_map),                       # packed params
                pl.BlockSpec((groups, tcout), lambda b, co: (0, co)),        # one-hot
                pl.BlockSpec((tcout, groups), lambda b, co: (co, 0)),        # one-hot^T
            ],
            out_specs=pl.BlockSpec((None, tcout, L), lambda b, co: (b, co, 0)),
        ),
        compiler_params=pltpu.CompilerParams(
            dimension_semantics=("parallel", "parallel"),
            vmem_limit_bytes=48 * 1024 * 1024,   # fits v7x's 64 MiB VMEM with headroom
        ),
    )(xcol, w2, params, onehot, onehot_t)


# ---------------------------------------------------------------------------
# Pure-JAX reference (mirrors the PyTorch module)
# ---------------------------------------------------------------------------
def block_ref(x, weight, bias, gn_gamma, gn_beta, scale_shift=None, groups=8):
    eps_ws = 1e-5 if x.dtype == jnp.float32 else 1e-3
    mean = jnp.mean(weight, axis=(1, 2), keepdims=True)
    var = jnp.mean((weight - mean) ** 2, axis=(1, 2), keepdims=True)
    w_std = (weight - mean) * lax.rsqrt(var + eps_ws)
    y = lax.conv_general_dilated(x, w_std, window_strides=(1,), padding=((1, 1),),
                                 dimension_numbers=("NCH", "OIH", "NCH"))
    y = y + bias[None, :, None]
    B, Cout, L = y.shape
    cg = Cout // groups
    yg = y.reshape(B, groups, cg, L)
    m = jnp.mean(yg, axis=(2, 3), keepdims=True)
    v = jnp.mean((yg - m) ** 2, axis=(2, 3), keepdims=True)
    yn = ((yg - m) * lax.rsqrt(v + 1e-5)).reshape(B, Cout, L)
    yn = yn * gn_gamma[None, :, None] + gn_beta[None, :, None]
    if scale_shift is not None:
        s, sh = scale_shift
        yn = yn * (s + 1.0) + sh
    return yn * jax.nn.sigmoid(yn)


if __name__ == "__main__":
    key = jax.random.PRNGKey(0)
    kx, kw, kb, kg, kbe, ks, ksh = jax.random.split(key, 7)

    B, Cin, Cout, L, K, groups = 2, 4, 8, 16, 3, 8

    x = jax.random.normal(kx, (B, Cin, L), dtype=jnp.float32)
    weight = 0.2 * jax.random.normal(kw, (Cout, Cin, K), dtype=jnp.float32)
    bias = 0.1 * jax.random.normal(kb, (Cout,), dtype=jnp.float32)
    gn_gamma = 1.0 + 0.1 * jax.random.normal(kg, (Cout,), dtype=jnp.float32)
    gn_beta = 0.1 * jax.random.normal(kbe, (Cout,), dtype=jnp.float32)
    scale = 0.1 * jax.random.normal(ks, (B, Cout, 1), dtype=jnp.float32)
    shift = 0.1 * jax.random.normal(ksh, (B, Cout, 1), dtype=jnp.float32)

    # FiLM path
    out = block_pallas(x, weight, bias, gn_gamma, gn_beta,
                       scale_shift=(scale, shift), groups=groups)
    jax.block_until_ready(out)
    ref = block_ref(x, weight, bias, gn_gamma, gn_beta,
                    scale_shift=(scale, shift), groups=groups)
    assert out.shape == (B, Cout, L)
    assert jnp.allclose(out, ref, atol=1e-3, rtol=1e-3), "mismatch vs reference (FiLM)"

    # scale_shift=None path (specialized: no extra inputs / ops)
    out0 = block_pallas(x, weight, bias, gn_gamma, gn_beta,
                        scale_shift=None, groups=groups)
    jax.block_until_ready(out0)
    ref0 = block_ref(x, weight, bias, gn_gamma, gn_beta,
                     scale_shift=None, groups=groups)
    assert jnp.allclose(out0, ref0, atol=1e-3, rtol=1e-3), "mismatch vs reference (None)"

    print("KERNEL_OK")
</pallas_src>

<mosaic_0001>
module attributes {stable_mosaic.version = 11 : i64} {
  func.func @_block_kernel(%arg0: i32, %arg1: i32, %arg2: memref<1x12x16xf32, #tpu.memory_space<vmem>>, %arg3: memref<8x12xf32, #tpu.memory_space<vmem>>, %arg4: memref<1x8x3xf32, #tpu.memory_space<vmem>>, %arg5: memref<8x8xf32, #tpu.memory_space<vmem>>, %arg6: memref<8x8xf32, #tpu.memory_space<vmem>>, %arg7: memref<1x8x16xf32, #tpu.memory_space<vmem>>) attributes {dimension_semantics = [#tpu.dimension_semantics<parallel>, #tpu.dimension_semantics<parallel>], iteration_bounds = array<i64: 2, 1>, scalar_prefetch = 0 : i64, scratch_operands = 0 : i64, tpu.core_type = #tpu.core_type<tc>, window_params = [{transform_indices = @transform_0, window_bounds = array<i64: 1, 12, 16>}, {transform_indices = @transform_1, window_bounds = array<i64: 8, 12>}, {transform_indices = @transform_2, window_bounds = array<i64: 1, 8, 3>}, {transform_indices = @transform_3, window_bounds = array<i64: 8, 8>}, {transform_indices = @transform_4, window_bounds = array<i64: 8, 8>}, {transform_indices = @transform_5, window_bounds = array<i64: 1, 8, 16>}]} {
    %c0 = arith.constant 0 : index
    %c0_0 = arith.constant 0 : index
    %0 = vector.load %arg3[%c0, %c0_0] : memref<8x12xf32, #tpu.memory_space<vmem>>, vector<8x12xf32>
    %c0_1 = arith.constant 0 : index
    %c0_2 = arith.constant 0 : index
    %c0_3 = arith.constant 0 : index
    %1 = vector.load %arg2[%c0_1, %c0_2, %c0_3] : memref<1x12x16xf32, #tpu.memory_space<vmem>>, vector<1x12x16xf32>
    %2 = vector.shape_cast %1 : vector<1x12x16xf32> to vector<12x16xf32>
    %cst = arith.constant dense<0.000000e+00> : vector<8x16xf32>
    %3 = tpu.matmul %0, %2, %cst {dimension_numbers = #tpu.dot_dimension_numbers<[1], [0], [0], [1], [0, 0, 1, 1], [], []>} : vector<8x12xf32>, vector<12x16xf32>, vector<8x16xf32> -> vector<8x16xf32>
    %c0_4 = arith.constant 0 : index
    %c0_5 = arith.constant 0 : index
    %c0_6 = arith.constant 0 : index
    %4 = vector.load %arg4[%c0_4, %c0_5, %c0_6] : memref<1x8x3xf32, #tpu.memory_space<vmem>>, vector<1x8x3xf32>
    %5 = vector.shape_cast %4 : vector<1x8x3xf32> to vector<8x3xf32>
    %6 = vector.extract_strided_slice %5 {offsets = [0, 0], sizes = [8, 1], strides = [1, 1]} : vector<8x3xf32> to vector<8x1xf32>
    %7 = vector.broadcast %6 : vector<8x1xf32> to vector<8x16xf32>
    %8 = arith.addf %3, %7 : vector<8x16xf32>
    %c0_7 = arith.constant 0 : index
    %c0_8 = arith.constant 0 : index
    %9 = vector.load %arg5[%c0_7, %c0_8] : memref<8x8xf32, #tpu.memory_space<vmem>>, vector<8x8xf32>
    %c0_9 = arith.constant 0 : index
    %c0_10 = arith.constant 0 : index
    %10 = vector.load %arg6[%c0_9, %c0_10] : memref<8x8xf32, #tpu.memory_space<vmem>>, vector<8x8xf32>
    %cst_11 = arith.constant dense<0.000000e+00> : vector<8xf32>
    %11 = vector.multi_reduction <add>, %8, %cst_11 [1] : vector<8x16xf32> to vector<8xf32>
    %12 = vector.shape_cast %11 : vector<8xf32> to vector<8x1xf32>
    %cst_12 = arith.constant dense<0.000000e+00> : vector<8x1xf32>
    %13 = tpu.matmul %9, %12, %cst_12 {dimension_numbers = #tpu.dot_dimension_numbers<[1], [0], [0], [1], [0, 0, 1, 1], [], []>} : vector<8x8xf32>, vector<8x1xf32>, vector<8x1xf32> -> vector<8x1xf32>
    %cst_13 = arith.constant dense<0.000000e+00> : vector<8x1xf32>
    %14 = tpu.matmul %10, %13, %cst_13 {dimension_numbers = #tpu.dot_dimension_numbers<[1], [0], [0], [1], [0, 0, 1, 1], [], []>} : vector<8x8xf32>, vector<8x1xf32>, vector<8x1xf32> -> vector<8x1xf32>
    %cst_14 = arith.constant 6.250000e-02 : f32
    %15 = vector.broadcast %cst_14 : f32 to vector<8x1xf32>
    %16 = arith.mulf %14, %15 : vector<8x1xf32>
    %17 = vector.broadcast %16 : vector<8x1xf32> to vector<8x16xf32>
    %18 = arith.subf %8, %17 : vector<8x16xf32>
    %19 = arith.mulf %18, %18 : vector<8x16xf32>
    %cst_15 = arith.constant dense<0.000000e+00> : vector<8xf32>
    %20 = vector.multi_reduction <add>, %19, %cst_15 [1] : vector<8x16xf32> to vector<8xf32>
    %21 = vector.shape_cast %20 : vector<8xf32> to vector<8x1xf32>
    %cst_16 = arith.constant dense<0.000000e+00> : vector<8x1xf32>
    %22 = tpu.matmul %9, %21, %cst_16 {dimension_numbers = #tpu.dot_dimension_numbers<[1], [0], [0], [1], [0, 0, 1, 1], [], []>} : vector<8x8xf32>, vector<8x1xf32>, vector<8x1xf32> -> vector<8x1xf32>
    %cst_17 = arith.constant dense<0.000000e+00> : vector<8x1xf32>
    %23 = tpu.matmul %10, %22, %cst_17 {dimension_numbers = #tpu.dot_dimension_numbers<[1], [0], [0], [1], [0, 0, 1, 1], [], []>} : vector<8x8xf32>, vector<8x1xf32>, vector<8x1xf32> -> vector<8x1xf32>
    %cst_18 = arith.constant 6.250000e-02 : f32
    %24 = vector.broadcast %cst_18 : f32 to vector<8x1xf32>
    %25 = arith.mulf %23, %24 : vector<8x1xf32>
    %cst_19 = arith.constant 9.99999974E-6 : f32
    %26 = vector.broadcast %cst_19 : f32 to vector<8x1xf32>
    %27 = arith.addf %25, %26 : vector<8x1xf32>
    %28 = math.rsqrt %27 : vector<8x1xf32>
    %29 = vector.broadcast %28 : vector<8x1xf32> to vector<8x16xf32>
    %30 = arith.mulf %18, %29 : vector<8x16xf32>
    %31 = vector.extract_strided_slice %5 {offsets = [0, 1], sizes = [8, 1], strides = [1, 1]} : vector<8x3xf32> to vector<8x1xf32>
    %32 = vector.broadcast %31 : vector<8x1xf32> to vector<8x16xf32>
    %33 = arith.mulf %30, %32 : vector<8x16xf32>
    %34 = vector.extract_strided_slice %5 {offsets = [0, 2], sizes = [8, 1], strides = [1, 1]} : vector<8x3xf32> to vector<8x1xf32>
    %35 = vector.broadcast %34 : vector<8x1xf32> to vector<8x16xf32>
    %36 = arith.addf %33, %35 : vector<8x16xf32>
    %37 = arith.negf %36 : vector<8x16xf32>
    %38 = math.exp %37 : vector<8x16xf32>
    %cst_20 = arith.constant 1.000000e+00 : f32
    %39 = vector.broadcast %cst_20 : f32 to vector<8x16xf32>
    %40 = arith.addf %39, %38 : vector<8x16xf32>
    %41 = arith.divf %39, %40 : vector<8x16xf32>
    %42 = arith.mulf %36, %41 : vector<8x16xf32>
    %c0_21 = arith.constant 0 : index
    %c0_22 = arith.constant 0 : index
    %c0_23 = arith.constant 0 : index
    %43 = vector.load %arg7[%c0_21, %c0_22, %c0_23] : memref<1x8x16xf32, #tpu.memory_space<vmem>>, vector<1x8x16xf32>
    %44 = vector.shape_cast %43 : vector<1x8x16xf32> to vector<8x16xf32>
    %45 = vector.shape_cast %42 : vector<8x16xf32> to vector<1x8x16xf32>
    tpu.vector_store %arg7[%c0_21, %c0_22, %c0_23], %45 {strides = array<i32>} : memref<1x8x16xf32, #tpu.memory_space<vmem>>, vector<1x8x16xf32>,
    return
  }
  func.func @transform_0(%arg0: i32, %arg1: i32) -> (i32, i32, i32) {
    %c0_i32 = arith.constant 0 : i32
    %c0_i32_0 = arith.constant 0 : i32
    %c0_i32_1 = arith.constant 0 : i32
    return %arg0, %c0_i32, %c0_i32_0 : i32, i32, i32
  }
  func.func @transform_1(%arg0: i32, %arg1: i32) -> (i32, i32) {
    %c0_i32 = arith.constant 0 : i32
    %c0_i32_0 = arith.constant 0 : i32
    return %arg1, %c0_i32 : i32, i32
  }
  func.func @transform_2(%arg0: i32, %arg1: i32) -> (i32, i32, i32) {
    %c0_i32 = arith.constant 0 : i32
    %c0_i32_0 = arith.constant 0 : i32
    return %arg0, %arg1, %c0_i32 : i32, i32, i32
  }
  func.func @transform_3(%arg0: i32, %arg1: i32) -> (i32, i32) {
    %c0_i32 = arith.constant 0 : i32
    %c0_i32_0 = arith.constant 0 : i32
    return %c0_i32, %arg1 : i32, i32
  }
  func.func @transform_4(%arg0: i32, %arg1: i32) -> (i32, i32) {
    %c0_i32 = arith.constant 0 : i32
    %c0_i32_0 = arith.constant 0 : i32
    return %arg1, %c0_i32 : i32, i32
  }
  func.func @transform_5(%arg0: i32, %arg1: i32) -> (i32, i32, i32) {
    %c0_i32 = arith.constant 0 : i32
    %c0_i32_0 = arith.constant 0 : i32
    return %arg0, %arg1, %c0_i32 : i32, i32, i32
  }
}

</mosaic_0001>

<bundles_post_ra>
// kernel: tpu_custom_call.1
= control target key start
LH: loop header
LB: loop body
LE: loop exit
PB: predicated region body
PF: predicated region fallthrough
CT: control target
= control target key end

     0   :  { %10 = vsyncpa [#allocation3], 0  ;;  %s1269_s0 = inlined_call_operand.vmem [shape: f32[2,12,16], index: 0, kind: input, shape index: {}]   ;;  %s1270_s1 = inlined_call_operand.vmem [shape: f32[8,12], index: 1, kind: input, shape index: {}]   ;;  %s1271_s2 = inlined_call_operand.vmem [shape: f32[2,8,3], index: 2, kind: input, shape index: {}]   ;;  %s1272_s3 = inlined_call_operand.vmem [shape: f32[8,8], index: 3, kind: input, shape index: {}]   ;;  %s1273_s4 = inlined_call_operand.vmem [shape: f32[8,8], index: 4, kind: input, shape index: {}]   ;;  %s1274_s5 = inlined_call_operand.hbm [shape: f32[2,8,16], index: 5, kind: output, shape index: {}]  }
   0x1   :  { %12 = vsyncpa [#allocation3 + $0x1], 0  ;;  %s1133_s18 = smov 0   ;;  %s1135_s19 = smov 0  }
   0x2   :  { %s1137_s20 = smov 0   ;;  %s1139_s21 = smov 0  }
   0x3   :  { %s1141_s22 = smov 0   ;;  %s1143_s23 = smov 0  }
   0x4 LB: > { %s877_s24 = sadd.s32 4294967295, %s1093_s23   ;;  %s878_s25 = sadd.s32 4294967294, %s1093_s23   ;;  %s1093_s23 = sphi %s1143_s23, %s18_s23   ;;  %s1089_s22 = sphi %s1141_s22, %s1281_s22   ;;  %s1085_s21 = sphi %s1139_s21, %s1280_s21   ;;  %s1081_s20 = sphi %s1137_s20, %s1279_s20   ;;  %s1077_s19 = sphi %s1135_s19, %s1278_s19   ;;  %s1073_s18 = sphi %s1133_s18, %s1277_s18  }
   0x5   : > { %s30_s26 = sadd.s32 1, %s1089_s22  ;;  %s171_s27 = sadd.s32 1, %s1081_s20 }
   0x6   : > { %p32_p0 = scmp.ge.s32.totalorder %s30_s26, 2  ;;  %p181_p1 = scmp.ne.s32.totalorder %s1081_s20, %s1077_s19 }
   0x7   : > { %p182_p2 = scmp.eq.s32.totalorder %s877_s24, 1  ;;  %p187_p3 = scmp.ne.s32.totalorder %s1077_s19, %s1073_s18 }
   0x8   : > { %s1283_s26 = smov (%p32_p0, %s30_s26), 0  ;;  %p188_p5 = scmp.eq.s32.totalorder %s878_s25, 1 }
   0x9   : > { %p1173_p4 = por %p182_p2, %p181_p1  ;;  %s166_s29 = ssub.s32 %s1089_s22, %s1283_s26 }
   0xa   : > { %p884_p6 = scmp.ge.s32.totalorder %s1093_s23, 1  ;;  %p169_p7 = scmp.eq.s32.totalorder %s166_s29, 0 }
   0xb   : > { %p1180_p8 = por %p188_p5, %p187_p3  ;;  %p245_p9 = scmp.lt.s32.totalorder %s1093_s23, 3 }
   0xc   : > { %s1186_s6 = scalar_select %p169_p7, %s1081_s20, %s171_s27  }
   0xd   : > { %p246_p10 = pnand %p884_p6, %p245_p9 }
   0xe   : > { %p292_p11 = scmp.lt.s32.totalorder (!%p246_p10), %s1085_s21, 1  ;;  %v1095_v0 = vmov (!%p246_p10), 0.0|0.0   ;;  %vm329_vm0 = vcmask (!%p246_p10), 1043456   ;;  %vm1096_vm1 = vmmov (!%p246_p10), 0   ;;  %v1097_v1 = vmov (!%p246_p10), 0.0   ;;  %v316_v7 = vld [vmem:[%s1270_s1] sm:$0xff] (!%p246_p10) }
   0xf   : > { %249 = sbr.rel (%p246_p10) target bundleno = 1710 (0x6ae), region = 40  ;;  %939 = vmatprep.subr.bf16.mxu0 (!%p246_p10), %v1095_v0  ;;  %916 = vmatprep.mubr.msk.f32.mxu0 (!%p246_p10), %vm1096_vm1, %v1097_v1  ;;  %v1098_v2 = vmov (!%p246_p10), 0   ;;  %vm1099_vm2 = vmmov (!%p246_p10), 1   ;;  %vm325_vm4 = vcmask (!%p246_p10), 97280   ;;  %vm405_vm5 = vcmask (!%p246_p10), 130048   ;;  %v403_v13 = vld [vmem:[%s1272_s3] sm:$0xff] (!%p246_p10) }
  0x10   : > { %1005 = vset.pattern.permute.xlu0 (!%p246_p10), %v1098_v2  ;;  %919 = vmatprep.subr.mxu1 (!%p246_p10), %v1097_v1  ;;  %vm941_vm3 = vmpackc.low (!%p246_p10), %vm329_vm0, %vm1099_vm2  ;;  %vm409_vm6 = vcmask (!%p246_p10), 64512   ;;  %v404_v15 = vld [vmem:[%s1273_s4] sm:$0xff] (!%p246_p10)  ;;  %v1100_v28 = vmov (!%p246_p10), 1   ;;  %v1101_v34 = vmov (!%p246_p10), 2  }
  0x11   : > { %921 = vmatprep.mubr.msk.f32.mxu1 (!%p246_p10), %vm1096_vm1, %v1097_v1  ;;  %1006 = vset.pattern.permute.xlu1 (!%p246_p10), %v1098_v2 }
  0x16   : > { %s293_s7 = scalar_select %p292_p11, %s1085_s21, 1 }
  0x18   : > { %s900_s8 = sshll.u32 %s293_s7, 4  ;;  %s888_s9 = sshll.u32 %s293_s7, 3 }
  0x19   : > { %s296_s12 = scalar_lea.vmem %s1269_s0, %s900_s8  ;;  %s307_s15 = scalar_lea.vmem %s1271_s2, %s888_s9 }
  0x1a   : > { %v317_v3 = vld [vmem:[%s296_s12] sm:$0xff]  ;;  %v318_v4 = vld [vmem:[%s296_s12 + $0x8] sm:$0xf]  ;;  %s289_s7 = sand.u32 1, %s1077_s19   ;;  %s897_s9 = sshll.u32 %s1085_s21, 7 }
  0x1b   : > { %v319_v5 = vld [vmem:[%s307_s15] sm:$0xff]  ;;  %v940_v6 = vpack.c.bf16 %v318_v4, %v317_v3  ;;  %s885_s8 = sshll.u32 %s289_s7, 3  ;;  %s1221_s14 = scalar_lea.hbm %s1274_s5, %s897_s9 }
  0x1c   : > { %322 = vperm.xlu0 %1005, %v319_v5   ;;  %s291_s10 = scalar_lea.vmem [#allocation2], %s885_s8  ;;  %s735_s15 = scalar_lea.sflag [#allocation3], %s289_s7 }
  0x1d   : > { %942 = vmatpush3.bf16.msk.msra.mxu0 %vm941_vm3, %v940_v6  ;;  %s749_s11 = sshll.u32 %s291_s10, 4  ;;  %s1102_s21 = smov [#allocation2]   ;;  %s1223_s11 = int_to_ptr.vmem [resolvable:$true] %s749_s11 }
  0x1e   : > { %929 = vmatprep.subr.mxu0 %v1097_v1  ;;  %s1015_s16 = scalar_lea.vmem %s1223_s11, 128  ;;  %s1019_s17 = sshll.u32 %s1102_s21, 4  ;;  %s1020_s17 = int_to_ptr.vmem [resolvable:$false] %s1019_s17 }
  0x1f   : > { %p1016_p12 = scmp.ne.s32.totalorder %s1223_s11, %s1015_s16  ;;  %s1021_s24 = scalar_lea.vmem %s1020_s17, 256 }
  0x20   : > { %917 = vmatmul.mubr.msk.f32.vlgmr.msra.gmra.mrb[0].mxu0 %vm325_vm4, %v316_v7  ;;  %p1022_p1 = scmp.lt.s32.totalorder %s1223_s11, %s1020_s17  ;;  %p1023_p2 = scmp.lt.s32.totalorder %s1021_s24, %s1015_s16 }
  0x21   : > { %931 = vmatprep.mubr.msk.f32.mxu0 %vm1096_vm1, %v1097_v1  ;;  %p1017_p13 = pnand %p1016_p12, %p1173_p4 }
  0x22   : > { %p1024_p3 = por %p1023_p2, %p1022_p1 }
  0x23   : > { %p1018_p0 = pneg %p1017_p13 }
  0x25   : > { %p1025_p5 = pnand %p1024_p3, %p1018_p0 }
  0x9b   : > { %v323_v8 = vpop.permute.xlu0 %322 }
  0xf3   : > { %v399_v9 = vpop.f32.mrb[0].mxu0 }
  0xf4   : > { %v400_v10 = vadd.f32 %v399_v9, %v323_v8  ;;  %v918_v11 = vpop.f32.mrb[1].mxu0 }
  0xf6   : > { %v406_v12 = vsel %vm405_vm5, %v400_v10, 0.0 }
  0xf7   : > { %407 = vadd.xlane.f32.xlu0 %v406_v12 }
 0x184   : > { %v408_v14 = vpop.xlane.xlu0 %407 }
 0x185   : > { %920 = vmatpush3.msra.mxu1 %v408_v14 }
 0x186   : > { %922 = vmatmul.mubr.msk.f32.vlgmr.msra.gmra.mrb[0].mxu1 %vm409_vm6, %v403_v13  ;;  %924 = vmatprep.subr.mxu1 %v1097_v1 }
 0x187   : > { %926 = vmatprep.mubr.msk.f32.mxu1 %vm1096_vm1, %v1097_v1 }
 0x259   : > { %v479_v16 = vpop.f32.mrb[0].mxu1 }
 0x25a   : > { %v923_v17 = vpop.f32.mrb[1].mxu1  ;;  %925 = vmatpush3.msra.mxu1 %v479_v16 }
 0x25b   : > { %927 = vmatmul.mubr.msk.f32.vlgmr.msra.gmra.mrb[2].mxu1 %vm409_vm6, %v404_v15  ;;  %934 = vmatprep.subr.mxu1 %v1097_v1 }
 0x25c   : > { %936 = vmatprep.mubr.msk.f32.mxu1 %vm1096_vm1, %v1097_v1 }
 0x32e   : > { %v552_v18 = vpop.f32.mrb[2].mxu1 }
 0x32f   : > { %v556_v19 = vmul.f32 0.0625, %v552_v18  ;;  %v928_v20 = vpop.f32.mrb[3].mxu1 }
 0x331   : > { %559 = vperm.xlu1 %1006, %v556_v19  }
 0x335   : > { %1007 = vset.pattern.permute.xlu1 %v1100_v28 }
 0x3b0   : > { %v560_v21 = vpop.permute.xlu1 %559 }
 0x3b1   : > { %v562_v22 = vsub.f32 %v400_v10, %v560_v21 }
 0x3b3   : > { %v563_v23 = vmul.f32 %v562_v22, %v562_v22 }
 0x3b5   : > { %v564_v24 = vsel %vm405_vm5, %v563_v23, 0.0 }
 0x3b6   : > { %565 = vadd.xlane.f32.xlu1 %v564_v24 }
 0x3c7   : > { %717 = vperm.xlu1 %1007, %v319_v5  }
 0x443   : > { %v566_v25 = vpop.xlane.xlu1 %565 }
 0x444   : > { %930 = vmatpush3.msra.mxu0 %v566_v25 }
 0x445   : > { %932 = vmatmul.mubr.msk.f32.vlgmr.msra.gmra.mrb[2].mxu0 %vm409_vm6, %v403_v13 }
 0x447   : > { %v718_v36 = vpop.permute.xlu1 %717 }
 0x518   : > { %v633_v26 = vpop.f32.mrb[2].mxu0 }
 0x519   : > { %v933_v27 = vpop.f32.mrb[3].mxu0  ;;  %935 = vmatpush3.msra.mxu1 %v633_v26 }
 0x51a   : > { %937 = vmatmul.mubr.msk.f32.vlgmr.msra.gmra.mrb[4].mxu1 %vm409_vm6, %v404_v15 }
 0x5ed   : > { %v703_v29 = vpop.f32.mrb[4].mxu1 }
 0x5ee   : > { %v707_v30 = vmul.f32 0.0625, %v703_v29  ;;  %v938_v31 = vpop.f32.mrb[5].mxu1 }
 0x5f0   : > { %v708_v32 = vadd.f32 1e-05, %v707_v30 }
 0x5f2   : > { %1009 = vrsqrt.f32 %v708_v32 }
 0x5fc   : > { %v1010_v33 = vpop.eup %1009 }
 0x5fd   : > { %712 = vperm.xlu0 %1005, %v1010_v33  }
 0x601   : > { %1008 = vset.pattern.permute.xlu0 %v1101_v34 }
 0x602   : > { %722 = vperm.xlu0 %1008, %v319_v5  }
 0x67c   : > { %v713_v35 = vpop.permute.xlu0 %712 }
 0x67d   : > { %v715_v37 = vmul.f32 %v713_v35, %v562_v22 }
 0x67f   : > { %v720_v38 = vmul.f32 %v718_v36, %v715_v37 }
 0x681   : > { %v723_v39 = vpop.permute.xlu0 %722 }
 0x682   : > { %v725_v40 = vadd.f32 %v723_v39, %v720_v38 }
 0x684   : > { %v895_v41 = vmul.f32 -1.442695, %v725_v40 }
 0x686   : > { %1011 = vpow2.f32 %v895_v41 }
 0x690   : > { %v1012_v42 = vpop.eup %1011 }
 0x691   : > { %v729_v43 = vadd.f32 1.0, %v1012_v42 }
 0x693   : > { %1013 = vrcp.f32 %v729_v43 }
 0x69d   : > { %v1014_v44 = vpop.eup %1013 }
 0x69e   : > { %v732_v45 = vmul.f32 %v1014_v44, %v725_v40 }
 0x6a0   : > { %733 = vst.msk [vmem:[%s291_s10] sm:$0xff] %vm405_vm5, %v732_v45 }
 0x6a1   : > { %1028 = shalt.err (!%p1025_p5)
}
 0x6a2   : > { %s1029_s25 = scalar_lea.hbm %s1221_s14, 128  ;;  %s1033_s7 = scalar_lea.hbm %s1274_s5, 256 }
 0x6a3   : > { %p1030_p6 = scmp.ne.s32.totalorder %s1221_s14, %s1029_s25  ;;  %p1034_p10 = scmp.lt.u32.totalorder %s1221_s14, %s1274_s5 }
 0x6a4   : > { %p1035_p11 = scmp.lt.u32.totalorder %s1033_s7, %s1029_s25  ;;  %p1037_p13 = scmp.lt.u32.totalorder %s1029_s25, %s1221_s14 }
 0x6a5   : > { %p1031_p7 = pnand %p1030_p6, %p1173_p4 }
 0x6a6   : > { %p1036_p12 = por %p1035_p11, %p1034_p10 }
 0x6a7   : > { %p1032_p9 = pneg %p1031_p7 }
 0x6a8   : > { %p1038_p0 = por %p1037_p13, %p1036_p12 }
 0x6aa   : > { %p1039_p1 = pnand %p1038_p0, %p1032_p9 }
 0x6ac   : > { %1042 = shalt.err (!%p1039_p1)
}
 0x6ad   : > { %943 = dma.vmem_to_hbm [thread:$0]  (%p1173_p4), %s1223_s11, 128, %s1221_s14, %s735_s15  }
 0x6ae PF: > { %p949_p2 = scmp.ge.s32.totalorder %s1093_s23, 2  ;;  %s761_s10 = sand.u32 1, %s1073_s18  }
 0x6af   : > { %s762_s12 = scalar_lea.sflag [#allocation3], %s761_s10 }
 0x6b0   : > { %p946_p3 = pnand %p949_p2, %p1180_p8 }
 0x6b2   : > { %1068 = dma.done.wait (!%p946_p3), %s762_s12, 128  }
 0x6b3   : > { %1070 = vsyncadd (!%p946_p3), %s762_s12, 4294967168  ;;  %s18_s23 = sadd.s32 1, %s1093_s23   ;;  %s1277_s18 = smov %s1077_s19 }
 0x6b4   : > { %p15_p5 = scmp.ge.s32.totalorder %s18_s23, 4   ;;  %s1278_s19 = smov %s1081_s20 }
 0x6b5   : > { %s1279_s20 = smov %s1186_s6  ;;  %s1280_s21 = smov %s1089_s22 }
 0x6b6   : > { %s1281_s22 = smov %s1283_s26  ;;  %17 = sbr.rel (!%p15_p5) target bundleno = 4 (0x4), region = 87 }
 0x6bd   :  { %767 = vsyncpa [#allocation3], 1 }
 0x6be   :  { %769 = vsyncpa [#allocation3 + $0x1], 1 }

</bundles_post_ra>
